<compile_context>
chip_gen: v6e
topology: v6e:2x2x1
jax: 0.10.0
libtpu: 0.0.40
codegen_flags: <defaults>
</compile_context>

<pallas_src>
import functools
import math

import jax
import jax.numpy as jnp
from jax.experimental import pallas as pl
from jax.experimental.pallas import tpu as pltpu

LANE = 128
SUBLANE = 8
VMEM_LIMIT = 32 * 1024 * 1024  # generous headroom, well under v7x's 64 MiB


def _round_up(x, m):
    return ((x + m - 1) // m) * m


# ----------------------------------------------------------------------------
# Pallas kernel: y = x @ w + b (optionally ReLU).  bf16 inputs, f32 accumulate.
# Grid over M tiles; w and b stay VMEM-resident across the grid.
# ----------------------------------------------------------------------------
def _matmul_bias_kernel(x_ref, w_ref, b_ref, o_ref, *, apply_relu):
    y = jnp.dot(x_ref[...], w_ref[...], preferred_element_type=jnp.float32)
    y = y + b_ref[...]                       # (1, Np) broadcast over rows, f32
    if apply_relu:
        y = jnp.maximum(y, 0.0)
    o_ref[...] = y.astype(o_ref.dtype)


def fused_matmul_bias(x, w_pad, b_pad, *, relu, block_m=512):
    """x: (M, K); w_pad: (Kp, Np) bf16 (K/N already lane-padded);
    b_pad: (1, Np) f32.  Returns padded (Mp, Np) f32; caller slices rows."""
    M, K = x.shape
    Kp, Np = w_pad.shape

    m8 = _round_up(max(M, 1), SUBLANE)
    tm = block_m if m8 >= block_m else m8
    Mp = _round_up(M, tm)

    x = x.astype(jnp.bfloat16)
    if (Mp, Kp) != (M, K):
        x = jnp.pad(x, ((0, Mp - M), (0, Kp - K)))

    kernel = functools.partial(_matmul_bias_kernel, apply_relu=relu)
    flops = 2 * Mp * Kp * Np
    bytes_accessed = Mp * Kp * 2 + Kp * Np * 2 + Np * 4 + Mp * Np * 4

    return pl.pallas_call(
        kernel,
        out_shape=jax.ShapeDtypeStruct((Mp, Np), jnp.float32),
        grid_spec=pltpu.PrefetchScalarGridSpec(
            num_scalar_prefetch=0,
            grid=(Mp // tm,),
            in_specs=[
                pl.BlockSpec((tm, Kp), lambda i: (i, 0)),
                pl.BlockSpec((Kp, Np), lambda i: (0, 0)),   # weight resident
                pl.BlockSpec((1, Np), lambda i: (0, 0)),    # bias resident
            ],
            out_specs=pl.BlockSpec((tm, Np), lambda i: (i, 0)),
        ),
        compiler_params=pltpu.CompilerParams(
            dimension_semantics=("parallel",),
            vmem_limit_bytes=VMEM_LIMIT,
        ),
        cost_estimate=pl.CostEstimate(
            flops=flops, transcendentals=0, bytes_accessed=bytes_accessed),
    )(x, w_pad, b_pad)


# ----------------------------------------------------------------------------
# Pallas kernel: fused 2-layer MLP  q = relu(x@W1+b1) @ W2 + b2
# Hidden activation lives only in registers/VMEM; never touches HBM.
# ----------------------------------------------------------------------------
def _mlp_kernel(x_ref, w1_ref, b1_ref, w2_ref, b2_ref, o_ref):
    h = jnp.dot(x_ref[...], w1_ref[...], preferred_element_type=jnp.float32)
    h = jnp.maximum(h + b1_ref[...], 0.0)
    q = jnp.dot(h.astype(w2_ref.dtype), w2_ref[...],
                preferred_element_type=jnp.float32)
    o_ref[...] = (q + b2_ref[...]).astype(o_ref.dtype)


def fused_mlp(x, w1, b1, w2, b2, *, block_m=256):
    """x: (M, K); w1: (Kp, Hp) bf16; w2: (Hp, Np) bf16; b*: (1, *) f32."""
    M, K = x.shape
    Kp, Hp = w1.shape
    _, Np = w2.shape

    m8 = _round_up(max(M, 1), SUBLANE)
    tm = block_m if m8 >= block_m else m8
    Mp = _round_up(M, tm)

    x = x.astype(jnp.bfloat16)
    if (Mp, Kp) != (M, K):
        x = jnp.pad(x, ((0, Mp - M), (0, Kp - K)))

    flops = 2 * Mp * Kp * Hp + 2 * Mp * Hp * Np
    bytes_accessed = Mp * Kp * 2 + Kp * Hp * 2 + Hp * Np * 2 + Mp * Np * 4

    return pl.pallas_call(
        _mlp_kernel,
        out_shape=jax.ShapeDtypeStruct((Mp, Np), jnp.float32),
        grid_spec=pltpu.PrefetchScalarGridSpec(
            num_scalar_prefetch=0,
            grid=(Mp // tm,),
            in_specs=[
                pl.BlockSpec((tm, Kp), lambda i: (i, 0)),
                pl.BlockSpec((Kp, Hp), lambda i: (0, 0)),
                pl.BlockSpec((1, Hp), lambda i: (0, 0)),
                pl.BlockSpec((Hp, Np), lambda i: (0, 0)),
                pl.BlockSpec((1, Np), lambda i: (0, 0)),
            ],
            out_specs=pl.BlockSpec((tm, Np), lambda i: (i, 0)),
        ),
        compiler_params=pltpu.CompilerParams(
            dimension_semantics=("parallel",),
            vmem_limit_bytes=VMEM_LIMIT,
        ),
        cost_estimate=pl.CostEstimate(
            flops=flops, transcendentals=0, bytes_accessed=bytes_accessed),
    )(x, w1, b1, w2, b2)


# ----------------------------------------------------------------------------
# im2col glue (plain JAX, STATIC kh/kw/stride/in_ch): NHWC -> (N*OH*OW, C*KH*KW)
# with inner flattening order (ic, kh, kw), matching PyTorch conv weights.
# Only the first `in_ch` (real, un-padded) channels are gathered.
# ----------------------------------------------------------------------------
def im2col(x, kh, kw, stride, in_ch):
    n, h, w, _ = x.shape
    oh = (h - kh) // stride + 1
    ow = (w - kw) // stride + 1
    cols = []
    for i in range(kh):
        for j in range(kw):
            cols.append(
                x[:, i: i + (oh - 1) * stride + 1: stride,
                     j: j + (ow - 1) * stride + 1: stride, :in_ch])
    patches = jnp.stack(cols, axis=-2)                    # (N, OH, OW, KH*KW, C)
    patches = jnp.transpose(patches, (0, 1, 2, 4, 3))     # (N, OH, OW, C, KH*KW)
    return patches.reshape(n * oh * ow, in_ch * kh * kw), oh, ow


def conv2d_relu(x_nhwc, layer, meta, block_m):
    """Valid-padding Conv2d + ReLU via im2col + fused Pallas matmul.
    Output keeps lane-padded channels (zeros in the padded columns)."""
    n = x_nhwc.shape[0]
    patches, oh, ow = im2col(x_nhwc.astype(jnp.bfloat16),
                             meta["kh"], meta["kw"], meta["stride"],
                             meta["in_ch"])
    y = fused_matmul_bias(patches, layer["w"], layer["b"], relu=True,
                          block_m=block_m)
    m = n * oh * ow
    ocp = layer["w"].shape[1]
    return y[:m].reshape(n, oh, ow, ocp)                  # NHWC, channels padded


# ----------------------------------------------------------------------------
# Parameters: PyTorch-layout raw init, then a one-time TPU-friendly preparation
# (bf16 cast, 128-lane padding, fc1 row permutation for NHWC flatten order).
# ----------------------------------------------------------------------------
def init_dqn_params(key, *, input_channels, out_features, img_size, hidden_dim,
                    n_repeats, channels, kernel_sizes, strides):
    raw = {"convs": []}
    prev_ch = input_channels * n_repeats
    h = img_size
    for ch, ks, sd in zip(channels, kernel_sizes, strides):
        key, kw_key, kb_key = jax.random.split(key, 3)
        fan_in = prev_ch * ks * ks
        bound = 1.0 / math.sqrt(fan_in)
        w = jax.random.uniform(kw_key, (ch, prev_ch, ks, ks),
                               minval=-bound, maxval=bound, dtype=jnp.float32)
        b = jax.random.uniform(kb_key, (ch,),
                               minval=-bound, maxval=bound, dtype=jnp.float32)
        raw["convs"].append({"w": w, "b": b})
        prev_ch = ch
        h = (h - ks) // sd + 1
    fc_size = prev_ch * h * h

    key, k1w, k1b, k2w, k2b = jax.random.split(key, 5)
    b1 = 1.0 / math.sqrt(fc_size)
    raw["fc1_w"] = jax.random.uniform(k1w, (fc_size, hidden_dim),
                                      minval=-b1, maxval=b1, dtype=jnp.float32)
    raw["fc1_b"] = jax.random.uniform(k1b, (hidden_dim,),
                                      minval=-b1, maxval=b1, dtype=jnp.float32)
    b2 = 1.0 / math.sqrt(hidden_dim)
    raw["fc2_w"] = jax.random.uniform(k2w, (hidden_dim, out_features),
                                      minval=-b2, maxval=b2, dtype=jnp.float32)
    raw["fc2_b"] = jax.random.uniform(k2b, (out_features,),
                                      minval=-b2, maxval=b2, dtype=jnp.float32)
    return raw


def prepare_dqn_params(raw, *, input_channels, n_repeats, img_size, hidden_dim,
                       out_features, channels, kernel_sizes, strides):
    """One-time conversion to TPU layout: bf16 weights, 128-lane padded K and N,
    fc1 rows permuted to accept the padded NHWC flatten order (no transpose in
    the forward pass).  Returns (params pytree of arrays, static meta)."""
    prev_ch = input_channels * n_repeats
    h = img_size
    conv_params, conv_meta = [], []
    for layer, ks, sd in zip(raw["convs"], kernel_sizes, strides):
        w, b = layer["w"], layer["b"]
        oc = w.shape[0]
        k = prev_ch * ks * ks
        kp = _round_up(k, LANE)
        ocp = _round_up(oc, LANE)
        w_mat = w.reshape(oc, k).T                                   # (K, OC)
        w_mat = jnp.pad(w_mat, ((0, kp - k), (0, ocp - oc))).astype(jnp.bfloat16)
        b_pad = jnp.pad(b, (0, ocp - oc)).astype(jnp.float32).reshape(1, ocp)
        conv_params.append({"w": w_mat, "b": b_pad})
        conv_meta.append(dict(kh=ks, kw=ks, stride=sd, in_ch=prev_ch))
        prev_ch = oc
        h = (h - ks) // sd + 1

    C = prev_ch
    Cp = _round_up(C, LANE)
    hp = _round_up(hidden_dim, LANE)
    np_ = _round_up(out_features, LANE)

    # fc1: PyTorch flatten order is (C, H, W); our activations are NHWC with
    # channels padded to Cp.  Permute + zero-pad the weight rows once here so
    # the forward pass can flatten NHWC directly (no transpose, no slice).
    fc1_w = raw["fc1_w"].reshape(C, h, h, hidden_dim)
    fc1_w = jnp.transpose(fc1_w, (1, 2, 0, 3))                       # (H, W, C, hid)
    fc1_w = jnp.pad(fc1_w, ((0, 0), (0, 0), (0, Cp - C), (0, hp - hidden_dim)))
    fc1_w = fc1_w.reshape(h * h * Cp, hp).astype(jnp.bfloat16)
    fc1_b = jnp.pad(raw["fc1_b"], (0, hp - hidden_dim)).astype(jnp.float32)
    fc1_b = fc1_b.reshape(1, hp)

    fc2_w = jnp.pad(raw["fc2_w"], ((0, hp - hidden_dim),
                                   (0, np_ - out_features))).astype(jnp.bfloat16)
    fc2_b = jnp.pad(raw["fc2_b"], (0, np_ - out_features)).astype(jnp.float32)
    fc2_b = fc2_b.reshape(1, np_)

    params = {"convs": conv_params, "fc1_w": fc1_w, "fc1_b": fc1_b,
              "fc2_w": fc2_w, "fc2_b": fc2_b}
    meta = {"convs": tuple(conv_meta), "out_features": out_features}
    return params, meta


# ----------------------------------------------------------------------------
# Forward pass: (N, C_in*n_repeats, H, W) f32 -> (N, out_features) f32
# ----------------------------------------------------------------------------
def dqn_forward(params, observations_nchw, *, meta, block_m=512):
    x = jnp.transpose(observations_nchw, (0, 2, 3, 1))       # NCHW -> NHWC once
    for layer, m in zip(params["convs"], meta["convs"]):
        x = conv2d_relu(x, layer, m, block_m)
    n = x.shape[0]
    x = x.reshape(n, -1)          # NHWC flatten; fc1_w was pre-permuted for this
    q = fused_mlp(x, params["fc1_w"], params["fc1_b"],
                  params["fc2_w"], params["fc2_b"])
    return q[:n, :meta["out_features"]]


if __name__ == "__main__":
    # Small-but-valid shapes for the conv chain k=[8,4,3], s=[4,2,1]:
    # img_size=36 -> 8 -> 3 -> 1 spatial; fc_size = 64.
    INPUT_CHANNELS = 1
    N_REPEATS = 4
    IMG_SIZE = 36
    HIDDEN_DIM = 128
    OUT_FEATURES = 6
    BATCH = 2
    CHANNELS = [32, 64, 64]
    KERNELS = [8, 4, 3]
    STRIDES = [4, 2, 1]

    key = jax.random.PRNGKey(0)
    pkey, xkey = jax.random.split(key)
    raw = init_dqn_params(
        pkey, input_channels=INPUT_CHANNELS, out_features=OUT_FEATURES,
        img_size=IMG_SIZE, hidden_dim=HIDDEN_DIM, n_repeats=N_REPEATS,
        channels=CHANNELS, kernel_sizes=KERNELS, strides=STRIDES)
    params, meta = prepare_dqn_params(
        raw, input_channels=INPUT_CHANNELS, n_repeats=N_REPEATS,
        img_size=IMG_SIZE, hidden_dim=HIDDEN_DIM, out_features=OUT_FEATURES,
        channels=CHANNELS, kernel_sizes=KERNELS, strides=STRIDES)

    x = jax.random.normal(
        xkey, (BATCH, INPUT_CHANNELS * N_REPEATS, IMG_SIZE, IMG_SIZE),
        dtype=jnp.float32)

    forward = jax.jit(functools.partial(dqn_forward, meta=meta))
    q_values = forward(params, x)
    jax.block_until_ready(q_values)
    assert q_values.shape == (BATCH, OUT_FEATURES), q_values.shape
    assert q_values.dtype == jnp.float32
    print("KERNEL_OK")
</pallas_src>

<mosaic_0001>
module attributes {stable_mosaic.version = 11 : i64} {
  func.func @_matmul_bias_kernel(%arg0: i32, %arg1: memref<128x256xbf16, #tpu.memory_space<vmem>>, %arg2: memref<256x128xbf16, #tpu.memory_space<vmem>>, %arg3: memref<1x128xf32, #tpu.memory_space<vmem>>, %arg4: memref<128x128xf32, #tpu.memory_space<vmem>>) attributes {dimension_semantics = [#tpu.dimension_semantics<parallel>], iteration_bounds = array<i64: 1>, scalar_prefetch = 0 : i64, scratch_operands = 0 : i64, tpu.core_type = #tpu.core_type<tc>, window_params = [{transform_indices = @transform_0, window_bounds = array<i64: 128, 256>}, {pipeline_mode = #tpu.pipeline_mode<synchronous>, transform_indices = @transform_1, window_bounds = array<i64: 256, 128>}, {pipeline_mode = #tpu.pipeline_mode<synchronous>, transform_indices = @transform_2, window_bounds = array<i64: 1, 128>}, {transform_indices = @transform_3, window_bounds = array<i64: 128, 128>}]} {
    %c0 = arith.constant 0 : index
    %c0_0 = arith.constant 0 : index
    %0 = vector.load %arg1[%c0, %c0_0] : memref<128x256xbf16, #tpu.memory_space<vmem>>, vector<128x256xbf16>
    %c0_1 = arith.constant 0 : index
    %c0_2 = arith.constant 0 : index
    %1 = vector.load %arg2[%c0_1, %c0_2] : memref<256x128xbf16, #tpu.memory_space<vmem>>, vector<256x128xbf16>
    %cst = arith.constant dense<0.000000e+00> : vector<128x128xf32>
    %2 = tpu.matmul %0, %1, %cst {dimension_numbers = #tpu.dot_dimension_numbers<[1], [0], [0], [1], [0, 0, 1, 1], [], []>} : vector<128x256xbf16>, vector<256x128xbf16>, vector<128x128xf32> -> vector<128x128xf32>
    %c0_3 = arith.constant 0 : index
    %c0_4 = arith.constant 0 : index
    %3 = vector.load %arg3[%c0_3, %c0_4] : memref<1x128xf32, #tpu.memory_space<vmem>>, vector<1x128xf32>
    %4 = vector.broadcast %3 : vector<1x128xf32> to vector<128x128xf32>
    %5 = arith.addf %2, %4 : vector<128x128xf32>
    %cst_5 = arith.constant 0.000000e+00 : f32
    %6 = vector.broadcast %cst_5 : f32 to vector<128x128xf32>
    %7 = arith.maximumf %5, %6 : vector<128x128xf32>
    %c0_6 = arith.constant 0 : index
    %c0_7 = arith.constant 0 : index
    %8 = vector.load %arg4[%c0_6, %c0_7] : memref<128x128xf32, #tpu.memory_space<vmem>>, vector<128x128xf32>
    tpu.vector_store %arg4[%c0_6, %c0_7], %7 {strides = array<i32>} : memref<128x128xf32, #tpu.memory_space<vmem>>, vector<128x128xf32>,
    return
  }
  func.func @transform_0(%arg0: i32) -> (i32, i32) {
    %c0_i32 = arith.constant 0 : i32
    %c0_i32_0 = arith.constant 0 : i32
    return %arg0, %c0_i32 : i32, i32
  }
  func.func @transform_1(%arg0: i32) -> (i32, i32) {
    %c0_i32 = arith.constant 0 : i32
    %c0_i32_0 = arith.constant 0 : i32
    %c0_i32_1 = arith.constant 0 : i32
    return %c0_i32, %c0_i32_0 : i32, i32
  }
  func.func @transform_2(%arg0: i32) -> (i32, i32) {
    %c0_i32 = arith.constant 0 : i32
    %c0_i32_0 = arith.constant 0 : i32
    %c0_i32_1 = arith.constant 0 : i32
    return %c0_i32, %c0_i32_0 : i32, i32
  }
  func.func @transform_3(%arg0: i32) -> (i32, i32) {
    %c0_i32 = arith.constant 0 : i32
    %c0_i32_0 = arith.constant 0 : i32
    return %arg0, %c0_i32 : i32, i32
  }
}

module attributes {stable_mosaic.version = 11 : i64} {
  func.func @_matmul_bias_kernel(%arg0: i32, %arg1: memref<24x512xbf16, #tpu.memory_space<vmem>>, %arg2: memref<512x128xbf16, #tpu.memory_space<vmem>>, %arg3: memref<1x128xf32, #tpu.memory_space<vmem>>, %arg4: memref<24x128xf32, #tpu.memory_space<vmem>>) attributes {dimension_semantics = [#tpu.dimension_semantics<parallel>], iteration_bounds = array<i64: 1>, scalar_prefetch = 0 : i64, scratch_operands = 0 : i64, tpu.core_type = #tpu.core_type<tc>, window_params = [{transform_indices = @transform_0, window_bounds = array<i64: 24, 512>}, {pipeline_mode = #tpu.pipeline_mode<synchronous>, transform_indices = @transform_1, window_bounds = array<i64: 512, 128>}, {pipeline_mode = #tpu.pipeline_mode<synchronous>, transform_indices = @transform_2, window_bounds = array<i64: 1, 128>}, {transform_indices = @transform_3, window_bounds = array<i64: 24, 128>}]} {
    %c0 = arith.constant 0 : index
    %c0_0 = arith.constant 0 : index
    %0 = vector.load %arg1[%c0, %c0_0] : memref<24x512xbf16, #tpu.memory_space<vmem>>, vector<24x512xbf16>
    %c0_1 = arith.constant 0 : index
    %c0_2 = arith.constant 0 : index
    %1 = vector.load %arg2[%c0_1, %c0_2] : memref<512x128xbf16, #tpu.memory_space<vmem>>, vector<512x128xbf16>
    %cst = arith.constant dense<0.000000e+00> : vector<24x128xf32>
    %2 = tpu.matmul %0, %1, %cst {dimension_numbers = #tpu.dot_dimension_numbers<[1], [0], [0], [1], [0, 0, 1, 1], [], []>} : vector<24x512xbf16>, vector<512x128xbf16>, vector<24x128xf32> -> vector<24x128xf32>
    %c0_3 = arith.constant 0 : index
    %c0_4 = arith.constant 0 : index
    %3 = vector.load %arg3[%c0_3, %c0_4] : memref<1x128xf32, #tpu.memory_space<vmem>>, vector<1x128xf32>
    %4 = vector.broadcast %3 : vector<1x128xf32> to vector<24x128xf32>
    %5 = arith.addf %2, %4 : vector<24x128xf32>
    %cst_5 = arith.constant 0.000000e+00 : f32
    %6 = vector.broadcast %cst_5 : f32 to vector<24x128xf32>
    %7 = arith.maximumf %5, %6 : vector<24x128xf32>
    %c0_6 = arith.constant 0 : index
    %c0_7 = arith.constant 0 : index
    %8 = vector.load %arg4[%c0_6, %c0_7] : memref<24x128xf32, #tpu.memory_space<vmem>>, vector<24x128xf32>
    tpu.vector_store %arg4[%c0_6, %c0_7], %7 {strides = array<i32>} : memref<24x128xf32, #tpu.memory_space<vmem>>, vector<24x128xf32>,
    return
  }
  func.func @transform_0(%arg0: i32) -> (i32, i32) {
    %c0_i32 = arith.constant 0 : i32
    %c0_i32_0 = arith.constant 0 : i32
    return %arg0, %c0_i32 : i32, i32
  }
  func.func @transform_1(%arg0: i32) -> (i32, i32) {
    %c0_i32 = arith.constant 0 : i32
    %c0_i32_0 = arith.constant 0 : i32
    %c0_i32_1 = arith.constant 0 : i32
    return %c0_i32, %c0_i32_0 : i32, i32
  }
  func.func @transform_2(%arg0: i32) -> (i32, i32) {
    %c0_i32 = arith.constant 0 : i32
    %c0_i32_0 = arith.constant 0 : i32
    %c0_i32_1 = arith.constant 0 : i32
    return %c0_i32, %c0_i32_0 : i32, i32
  }
  func.func @transform_3(%arg0: i32) -> (i32, i32) {
    %c0_i32 = arith.constant 0 : i32
    %c0_i32_0 = arith.constant 0 : i32
    return %arg0, %c0_i32 : i32, i32
  }
}

module attributes {stable_mosaic.version = 11 : i64} {
  func.func @_matmul_bias_kernel(%arg0: i32, %arg1: memref<8x640xbf16, #tpu.memory_space<vmem>>, %arg2: memref<640x128xbf16, #tpu.memory_space<vmem>>, %arg3: memref<1x128xf32, #tpu.memory_space<vmem>>, %arg4: memref<8x128xf32, #tpu.memory_space<vmem>>) attributes {dimension_semantics = [#tpu.dimension_semantics<parallel>], iteration_bounds = array<i64: 1>, scalar_prefetch = 0 : i64, scratch_operands = 0 : i64, tpu.core_type = #tpu.core_type<tc>, window_params = [{transform_indices = @transform_0, window_bounds = array<i64: 8, 640>}, {pipeline_mode = #tpu.pipeline_mode<synchronous>, transform_indices = @transform_1, window_bounds = array<i64: 640, 128>}, {pipeline_mode = #tpu.pipeline_mode<synchronous>, transform_indices = @transform_2, window_bounds = array<i64: 1, 128>}, {transform_indices = @transform_3, window_bounds = array<i64: 8, 128>}]} {
    %c0 = arith.constant 0 : index
    %c0_0 = arith.constant 0 : index
    %0 = vector.load %arg1[%c0, %c0_0] : memref<8x640xbf16, #tpu.memory_space<vmem>>, vector<8x640xbf16>
    %c0_1 = arith.constant 0 : index
    %c0_2 = arith.constant 0 : index
    %1 = vector.load %arg2[%c0_1, %c0_2] : memref<640x128xbf16, #tpu.memory_space<vmem>>, vector<640x128xbf16>
    %cst = arith.constant dense<0.000000e+00> : vector<8x128xf32>
    %2 = tpu.matmul %0, %1, %cst {dimension_numbers = #tpu.dot_dimension_numbers<[1], [0], [0], [1], [0, 0, 1, 1], [], []>} : vector<8x640xbf16>, vector<640x128xbf16>, vector<8x128xf32> -> vector<8x128xf32>
    %c0_3 = arith.constant 0 : index
    %c0_4 = arith.constant 0 : index
    %3 = vector.load %arg3[%c0_3, %c0_4] : memref<1x128xf32, #tpu.memory_space<vmem>>, vector<1x128xf32>
    %4 = vector.broadcast %3 : vector<1x128xf32> to vector<8x128xf32>
    %5 = arith.addf %2, %4 : vector<8x128xf32>
    %cst_5 = arith.constant 0.000000e+00 : f32
    %6 = vector.broadcast %cst_5 : f32 to vector<8x128xf32>
    %7 = arith.maximumf %5, %6 : vector<8x128xf32>
    %c0_6 = arith.constant 0 : index
    %c0_7 = arith.constant 0 : index
    %8 = vector.load %arg4[%c0_6, %c0_7] : memref<8x128xf32, #tpu.memory_space<vmem>>, vector<8x128xf32>
    tpu.vector_store %arg4[%c0_6, %c0_7], %7 {strides = array<i32>} : memref<8x128xf32, #tpu.memory_space<vmem>>, vector<8x128xf32>,
    return
  }
  func.func @transform_0(%arg0: i32) -> (i32, i32) {
    %c0_i32 = arith.constant 0 : i32
    %c0_i32_0 = arith.constant 0 : i32
    return %arg0, %c0_i32 : i32, i32
  }
  func.func @transform_1(%arg0: i32) -> (i32, i32) {
    %c0_i32 = arith.constant 0 : i32
    %c0_i32_0 = arith.constant 0 : i32
    %c0_i32_1 = arith.constant 0 : i32
    return %c0_i32, %c0_i32_0 : i32, i32
  }
  func.func @transform_2(%arg0: i32) -> (i32, i32) {
    %c0_i32 = arith.constant 0 : i32
    %c0_i32_0 = arith.constant 0 : i32
    %c0_i32_1 = arith.constant 0 : i32
    return %c0_i32, %c0_i32_0 : i32, i32
  }
  func.func @transform_3(%arg0: i32) -> (i32, i32) {
    %c0_i32 = arith.constant 0 : i32
    %c0_i32_0 = arith.constant 0 : i32
    return %arg0, %c0_i32 : i32, i32
  }
}

module attributes {stable_mosaic.version = 11 : i64} {
  func.func @_mlp_kernel(%arg0: i32, %arg1: memref<8x128xbf16, #tpu.memory_space<vmem>>, %arg2: memref<128x128xbf16, #tpu.memory_space<vmem>>, %arg3: memref<1x128xf32, #tpu.memory_space<vmem>>, %arg4: memref<128x128xbf16, #tpu.memory_space<vmem>>, %arg5: memref<1x128xf32, #tpu.memory_space<vmem>>, %arg6: memref<8x128xf32, #tpu.memory_space<vmem>>) attributes {dimension_semantics = [#tpu.dimension_semantics<parallel>], iteration_bounds = array<i64: 1>, scalar_prefetch = 0 : i64, scratch_operands = 0 : i64, tpu.core_type = #tpu.core_type<tc>, window_params = [{transform_indices = @transform_0, window_bounds = array<i64: 8, 128>}, {pipeline_mode = #tpu.pipeline_mode<synchronous>, transform_indices = @transform_1, window_bounds = array<i64: 128, 128>}, {pipeline_mode = #tpu.pipeline_mode<synchronous>, transform_indices = @transform_2, window_bounds = array<i64: 1, 128>}, {pipeline_mode = #tpu.pipeline_mode<synchronous>, transform_indices = @transform_3, window_bounds = array<i64: 128, 128>}, {pipeline_mode = #tpu.pipeline_mode<synchronous>, transform_indices = @transform_4, window_bounds = array<i64: 1, 128>}, {transform_indices = @transform_5, window_bounds = array<i64: 8, 128>}]} {
    %c0 = arith.constant 0 : index
    %c0_0 = arith.constant 0 : index
    %0 = vector.load %arg1[%c0, %c0_0] : memref<8x128xbf16, #tpu.memory_space<vmem>>, vector<8x128xbf16>
    %c0_1 = arith.constant 0 : index
    %c0_2 = arith.constant 0 : index
    %1 = vector.load %arg2[%c0_1, %c0_2] : memref<128x128xbf16, #tpu.memory_space<vmem>>, vector<128x128xbf16>
    %cst = arith.constant dense<0.000000e+00> : vector<8x128xf32>
    %2 = tpu.matmul %0, %1, %cst {dimension_numbers = #tpu.dot_dimension_numbers<[1], [0], [0], [1], [0, 0, 1, 1], [], []>} : vector<8x128xbf16>, vector<128x128xbf16>, vector<8x128xf32> -> vector<8x128xf32>
    %c0_3 = arith.constant 0 : index
    %c0_4 = arith.constant 0 : index
    %3 = vector.load %arg3[%c0_3, %c0_4] : memref<1x128xf32, #tpu.memory_space<vmem>>, vector<1x128xf32>
    %4 = vector.broadcast %3 : vector<1x128xf32> to vector<8x128xf32>
    %5 = arith.addf %2, %4 : vector<8x128xf32>
    %cst_5 = arith.constant 0.000000e+00 : f32
    %6 = vector.broadcast %cst_5 : f32 to vector<8x128xf32>
    %7 = arith.maximumf %5, %6 : vector<8x128xf32>
    %8 = arith.truncf %7 : vector<8x128xf32> to vector<8x128xbf16>
    %c0_6 = arith.constant 0 : index
    %c0_7 = arith.constant 0 : index
    %9 = vector.load %arg4[%c0_6, %c0_7] : memref<128x128xbf16, #tpu.memory_space<vmem>>, vector<128x128xbf16>
    %cst_8 = arith.constant dense<0.000000e+00> : vector<8x128xf32>
    %10 = tpu.matmul %8, %9, %cst_8 {dimension_numbers = #tpu.dot_dimension_numbers<[1], [0], [0], [1], [0, 0, 1, 1], [], []>} : vector<8x128xbf16>, vector<128x128xbf16>, vector<8x128xf32> -> vector<8x128xf32>
    %c0_9 = arith.constant 0 : index
    %c0_10 = arith.constant 0 : index
    %11 = vector.load %arg5[%c0_9, %c0_10] : memref<1x128xf32, #tpu.memory_space<vmem>>, vector<1x128xf32>
    %12 = vector.broadcast %11 : vector<1x128xf32> to vector<8x128xf32>
    %13 = arith.addf %10, %12 : vector<8x128xf32>
    %c0_11 = arith.constant 0 : index
    %c0_12 = arith.constant 0 : index
    %14 = vector.load %arg6[%c0_11, %c0_12] : memref<8x128xf32, #tpu.memory_space<vmem>>, vector<8x128xf32>
    tpu.vector_store %arg6[%c0_11, %c0_12], %13 {strides = array<i32>} : memref<8x128xf32, #tpu.memory_space<vmem>>, vector<8x128xf32>,
    return
  }
  func.func @transform_0(%arg0: i32) -> (i32, i32) {
    %c0_i32 = arith.constant 0 : i32
    %c0_i32_0 = arith.constant 0 : i32
    return %arg0, %c0_i32 : i32, i32
  }
  func.func @transform_1(%arg0: i32) -> (i32, i32) {
    %c0_i32 = arith.constant 0 : i32
    %c0_i32_0 = arith.constant 0 : i32
    %c0_i32_1 = arith.constant 0 : i32
    return %c0_i32, %c0_i32_0 : i32, i32
  }
  func.func @transform_2(%arg0: i32) -> (i32, i32) {
    %c0_i32 = arith.constant 0 : i32
    %c0_i32_0 = arith.constant 0 : i32
    %c0_i32_1 = arith.constant 0 : i32
    return %c0_i32, %c0_i32_0 : i32, i32
  }
  func.func @transform_3(%arg0: i32) -> (i32, i32) {
    %c0_i32 = arith.constant 0 : i32
    %c0_i32_0 = arith.constant 0 : i32
    %c0_i32_1 = arith.constant 0 : i32
    return %c0_i32, %c0_i32_0 : i32, i32
  }
  func.func @transform_4(%arg0: i32) -> (i32, i32) {
    %c0_i32 = arith.constant 0 : i32
    %c0_i32_0 = arith.constant 0 : i32
    %c0_i32_1 = arith.constant 0 : i32
    return %c0_i32, %c0_i32_0 : i32, i32
  }
  func.func @transform_5(%arg0: i32) -> (i32, i32) {
    %c0_i32 = arith.constant 0 : i32
    %c0_i32_0 = arith.constant 0 : i32
    return %arg0, %c0_i32 : i32, i32
  }
}

</mosaic_0001>

<bundles_post_ra>
// kernel: dqn_forward.4
= control target key start
LH: loop header
LB: loop body
LE: loop exit
PB: predicated region body
PF: predicated region fallthrough
CT: control target
= control target key end

     0   :  { %s717_s1 = inlined_call_operand.vmem [shape: bf16[256,128], index: 1, kind: input, shape index: {}]   ;;  %s718_s0 = inlined_call_operand.vmem [shape: bf16[128,256], index: 0, kind: input, shape index: {}]   ;;  %s719_s2 = inlined_call_operand.vmem [shape: f32[1,128], index: 2, kind: input, shape index: {}]   ;;  %s720_s3 = inlined_call_operand.vmem [shape: f32[128,128], index: 3, kind: output, shape index: {}]  }
   0x1   :  { %v492_v0 = vld [vmem:[%s717_s1 + $0x78] sm:$0xff]   ;;  %v494_v2 = vld [vmem:[%s717_s1 + $0x70] sm:$0xff]   ;;  %v496_v4 = vld [vmem:[%s717_s1 + $0x68] sm:$0xff]  }
   0x2   :  { %v493_v1 = vld [vmem:[%s717_s1 + $0x38] sm:$0xff]   ;;  %412 = vmatprep.subr.bf16.mxu0 %v492_v0  ;;  %476 = vmatprep.subr.bf16.mxu1 %v492_v0  ;;  %v495_v3 = vld [vmem:[%s717_s1 + $0x30] sm:$0xff]   ;;  %v497_v5 = vld [vmem:[%s717_s1 + $0x28] sm:$0xff]  }
   0x3   :  { %413 = vmatpush3.bf16.msra.mxu0 %v493_v1  ;;  %484 = vmatpush3.bf16.msra.mxu1 %v493_v1  ;;  %v498_v6 = vld [vmem:[%s717_s1 + $0x60] sm:$0xff]   ;;  %v500_v8 = vld [vmem:[%s717_s1 + $0x58] sm:$0xff]   ;;  %v502_v10 = vld [vmem:[%s717_s1 + $0x50] sm:$0xff]  }
   0x4   :  { %414 = vmatprep.subr.bf16.mxu0 %v494_v2  ;;  %477 = vmatprep.subr.bf16.mxu1 %v494_v2  ;;  %v499_v7 = vld [vmem:[%s717_s1 + $0x20] sm:$0xff]   ;;  %v501_v9 = vld [vmem:[%s717_s1 + $0x18] sm:$0xff]   ;;  %v503_v13 = vld [vmem:[%s717_s1 + $0x10] sm:$0xff]  }
   0x5   :  { %v510_v11 = vld [vmem:[%s718_s0 + $0x4] ss:$8 sps:$4 sm:$0xff]   ;;  %v508_v18 = vld [vmem:[%s718_s0] ss:$8 sps:$4 sm:$0xff]   ;;  %v514_v20 = vld [vmem:[%s718_s0 + $0x14] ss:$8 sps:$4 sm:$0xff]  }
   0x6   :  { %v513_v12 = vld [vmem:[%s718_s0 + $0x44] ss:$8 sps:$4 sm:$0xff]   ;;  %278 = vmatprep.mubr.bf16.mxu0 %v510_v11  ;;  %v511_v19 = vld [vmem:[%s718_s0 + $0x40] ss:$8 sps:$4 sm:$0xff]   ;;  %v516_v21 = vld [vmem:[%s718_s0 + $0x54] ss:$8 sps:$4 sm:$0xff]  }
   0x7   :  { %415 = vmatpush3.bf16.msra.mxu0 %v495_v3  ;;  %485 = vmatpush3.bf16.msra.mxu1 %v495_v3  ;;  %v504_v14 = vld [vmem:[%s717_s1 + $0x48] sm:$0xff]   ;;  %v506_v16 = vld [vmem:[%s717_s1 + $0x40] sm:$0xff]   ;;  %v518_v22 = vld [vmem:[%s718_s0 + $0x10] ss:$8 sps:$4 sm:$0xff]  }
   0x8   :  { %416 = vmatprep.subr.bf16.mxu0 %v496_v4  ;;  %478 = vmatprep.subr.bf16.mxu1 %v496_v4  ;;  %v505_v15 = vld [vmem:[%s717_s1 + $0x8] sm:$0xff]   ;;  %v507_v17 = vld [vmem:[%s717_s1] sm:$0xff]   ;;  %v519_v23 = vld [vmem:[%s718_s0 + $0x50] ss:$8 sps:$4 sm:$0xff]  }
   0x9   :  { %310 = vmatprep.mubr.bf16.mxu1 %v513_v12  ;;  %v520_v24 = vld [vmem:[%s718_s0 + $0x24] ss:$8 sps:$4 sm:$0xff]   ;;  %v524_v26 = vld [vmem:[%s718_s0 + $0x20] ss:$8 sps:$4 sm:$0xff]   ;;  %v526_v28 = vld [vmem:[%s718_s0 + $0x34] ss:$8 sps:$4 sm:$0xff]  }
   0xa   :  { %v522_v25 = vld [vmem:[%s718_s0 + $0x64] ss:$8 sps:$4 sm:$0xff]   ;;  %v525_v27 = vld [vmem:[%s718_s0 + $0x60] ss:$8 sps:$4 sm:$0xff]   ;;  %v528_v29 = vld [vmem:[%s718_s0 + $0x74] ss:$8 sps:$4 sm:$0xff]  }
   0xb   :  { %417 = vmatpush3.bf16.msra.mxu0 %v497_v5  ;;  %486 = vmatpush3.bf16.msra.mxu1 %v497_v5  ;;  %v530_v30 = vld [vmem:[%s718_s0 + $0x30] ss:$8 sps:$4 sm:$0xff]   ;;  %v651_v34 = vld [vmem:[%s719_s2] ss:$0 sm:$0xff] }
   0xc   :  { %418 = vmatprep.subr.bf16.mxu0 %v498_v6  ;;  %479 = vmatprep.subr.bf16.mxu1 %v498_v6  ;;  %v531_v31 = vld [vmem:[%s718_s0 + $0x70] ss:$8 sps:$4 sm:$0xff]  }
   0xf   :  { %419 = vmatpush3.bf16.msra.mxu0 %v499_v7  ;;  %487 = vmatpush3.bf16.msra.mxu1 %v499_v7 }
  0x10   :  { %420 = vmatprep.subr.bf16.mxu0 %v500_v8  ;;  %480 = vmatprep.subr.bf16.mxu1 %v500_v8 }
  0x13   :  { %421 = vmatpush3.bf16.msra.mxu0 %v501_v9  ;;  %488 = vmatpush3.bf16.msra.mxu1 %v501_v9 }
  0x14   :  { %422 = vmatprep.subr.bf16.mxu0 %v502_v10  ;;  %481 = vmatprep.subr.bf16.mxu1 %v502_v10 }
  0x17   :  { %423 = vmatpush3.bf16.msra.mxu0 %v503_v13  ;;  %489 = vmatpush3.bf16.msra.mxu1 %v503_v13 }
  0x18   :  { %424 = vmatprep.subr.bf16.mxu0 %v504_v14  ;;  %482 = vmatprep.subr.bf16.mxu1 %v504_v14 }
  0x1b   :  { %425 = vmatpush3.bf16.msra.mxu0 %v505_v15  ;;  %490 = vmatpush3.bf16.msra.mxu1 %v505_v15 }
  0x1c   :  { %426 = vmatprep.subr.bf16.mxu0 %v506_v16  ;;  %483 = vmatprep.subr.bf16.mxu1 %v506_v16 }
  0x1f   :  { %427 = vmatpush3.bf16.msra.mxu0 %v507_v17  ;;  %491 = vmatpush3.bf16.msra.mxu1 %v507_v17 }
  0x22   :  { %279 = vmatmul.mubr.bf16.vlgmr.msra.gmra.mxu0 %v508_v18  ;;  %311 = vmatmul.mubr.bf16.vlgmr.msra.gmra.mxu1 %v511_v19 }
  0x23   :  { %286 = vmatprep.mubr.bf16.mxu0 %v514_v20  ;;  %318 = vmatprep.mubr.bf16.mxu1 %v516_v21 }
  0x2a   :  { %287 = vmatmul.mubr.bf16.gmra.mxu0 %v518_v22  ;;  %319 = vmatmul.mubr.bf16.gmra.mxu1 %v519_v23 }
  0x2b   :  { %294 = vmatprep.mubr.bf16.mxu0 %v520_v24  ;;  %326 = vmatprep.mubr.bf16.mxu1 %v522_v25 }
  0x32   :  { %295 = vmatmul.mubr.bf16.gmra.mxu0 %v524_v26  ;;  %327 = vmatmul.mubr.bf16.gmra.mxu1 %v525_v27 }
  0x33   :  { %302 = vmatprep.mubr.bf16.mxu0 %v526_v28  ;;  %334 = vmatprep.mubr.bf16.mxu1 %v528_v29 }
  0x3a   :  { %303 = vmatmul.mubr.bf16.gmra.mxu0 %v530_v30  ;;  %335 = vmatmul.mubr.bf16.gmra.mxu1 %v531_v31 }
  0xe2   :  { %v428_v32 = vpop.f32.mrf.mxu0  ;;  %v452_v33 = vpop.f32.mrf.mxu1 }
  0xe4   :  { %v429_v35 = vpop.f32.mrf.mxu0  ;;  %v453_v36 = vpop.f32.mrf.mxu1 }
  0xe5   :  { %v430_v37 = vadd.f32 %v429_v35, %v428_v32  ;;  %v454_v38 = vadd.f32 %v453_v36, %v452_v33 }
  0xe6   :  { %v431_v39 = vpop.f32.mrf.mxu0  ;;  %v455_v40 = vpop.f32.mrf.mxu1 }
  0xe7   :  { %v281_v41 = vadd.f32 %v430_v37, %v651_v34  ;;  %v313_v42 = vadd.f32 %v454_v38, %v651_v34 }
  0xe8   :  { %v432_v43 = vpop.f32.mrf.mxu0  ;;  %v456_v44 = vpop.f32.mrf.mxu1 }
  0xe9   :  { %v343_v45 = vmax.f32 %v281_v41, 0.0  ;;  %v351_v46 = vmax.f32 %v313_v42, 0.0  ;;  %v433_v47 = vadd.f32 %v432_v43, %v431_v39  ;;  %v457_v48 = vadd.f32 %v456_v44, %v455_v40 }
  0xea   :  { %v434_v49 = vpop.f32.mrf.mxu0  ;;  %v458_v50 = vpop.f32.mrf.mxu1 }
  0xeb   :  { %359 = vst [vmem:[%s720_s3] sm:$0xff] %v343_v45  ;;  %367 = vst [vmem:[%s720_s3 + $0x40] sm:$0xff] %v351_v46  ;;  %v284_v51 = vadd.f32 %v433_v47, %v651_v34  ;;  %v316_v52 = vadd.f32 %v457_v48, %v651_v34 }
  0xec   :  { %v435_v53 = vpop.f32.mrf.mxu0  ;;  %v459_v54 = vpop.f32.mrf.mxu1 }
  0xed   :  { %v344_v55 = vmax.f32 %v284_v51, 0.0  ;;  %v352_v56 = vmax.f32 %v316_v52, 0.0  ;;  %v436_v57 = vadd.f32 %v435_v53, %v434_v49  ;;  %v460_v58 = vadd.f32 %v459_v54, %v458_v50 }
  0xee   :  { %v437_v59 = vpop.f32.mrf.mxu0  ;;  %v461_v60 = vpop.f32.mrf.mxu1 }
  0xef   :  { %360 = vst [vmem:[%s720_s3 + $0x8] sm:$0xff] %v344_v55  ;;  %368 = vst [vmem:[%s720_s3 + $0x48] sm:$0xff] %v352_v56  ;;  %v289_v61 = vadd.f32 %v436_v57, %v651_v34  ;;  %v321_v62 = vadd.f32 %v460_v58, %v651_v34 }
  0xf0   :  { %v438_v63 = vpop.f32.mrf.mxu0  ;;  %v462_v0 = vpop.f32.mrf.mxu1 }
  0xf1   :  { %v345_v1 = vmax.f32 %v289_v61, 0.0  ;;  %v353_v2 = vmax.f32 %v321_v62, 0.0  ;;  %v439_v3 = vadd.f32 %v438_v63, %v437_v59  ;;  %v463_v4 = vadd.f32 %v462_v0, %v461_v60 }
  0xf2   :  { %v440_v5 = vpop.f32.mrf.mxu0  ;;  %v464_v6 = vpop.f32.mrf.mxu1 }
  0xf3   :  { %361 = vst [vmem:[%s720_s3 + $0x10] sm:$0xff] %v345_v1  ;;  %369 = vst [vmem:[%s720_s3 + $0x50] sm:$0xff] %v353_v2  ;;  %v292_v7 = vadd.f32 %v439_v3, %v651_v34  ;;  %v324_v8 = vadd.f32 %v463_v4, %v651_v34 }
  0xf4   :  { %v441_v9 = vpop.f32.mrf.mxu0  ;;  %v465_v10 = vpop.f32.mrf.mxu1 }
  0xf5   :  { %v346_v11 = vmax.f32 %v292_v7, 0.0  ;;  %v354_v12 = vmax.f32 %v324_v8, 0.0  ;;  %v442_v13 = vadd.f32 %v441_v9, %v440_v5  ;;  %v466_v14 = vadd.f32 %v465_v10, %v464_v6 }
  0xf6   :  { %v443_v15 = vpop.f32.mrf.mxu0  ;;  %v467_v16 = vpop.f32.mrf.mxu1 }
  0xf7   :  { %362 = vst [vmem:[%s720_s3 + $0x18] sm:$0xff] %v346_v11  ;;  %370 = vst [vmem:[%s720_s3 + $0x58] sm:$0xff] %v354_v12  ;;  %v297_v17 = vadd.f32 %v442_v13, %v651_v34  ;;  %v329_v18 = vadd.f32 %v466_v14, %v651_v34 }
  0xf8   :  { %v444_v19 = vpop.f32.mrf.mxu0  ;;  %v468_v20 = vpop.f32.mrf.mxu1 }
  0xf9   :  { %v347_v21 = vmax.f32 %v297_v17, 0.0  ;;  %v355_v22 = vmax.f32 %v329_v18, 0.0  ;;  %v445_v23 = vadd.f32 %v444_v19, %v443_v15  ;;  %v469_v24 = vadd.f32 %v468_v20, %v467_v16 }
  0xfa   :  { %v446_v25 = vpop.f32.mrf.mxu0  ;;  %v470_v26 = vpop.f32.mrf.mxu1 }
  0xfb   :  { %363 = vst [vmem:[%s720_s3 + $0x20] sm:$0xff] %v347_v21  ;;  %371 = vst [vmem:[%s720_s3 + $0x60] sm:$0xff] %v355_v22  ;;  %v300_v27 = vadd.f32 %v445_v23, %v651_v34  ;;  %v332_v28 = vadd.f32 %v469_v24, %v651_v34 }
  0xfc   :  { %v447_v29 = vpop.f32.mrf.mxu0  ;;  %v471_v30 = vpop.f32.mrf.mxu1 }
  0xfd   :  { %v348_v31 = vmax.f32 %v300_v27, 0.0  ;;  %v356_v32 = vmax.f32 %v332_v28, 0.0  ;;  %v448_v33 = vadd.f32 %v447_v29, %v446_v25  ;;  %v472_v35 = vadd.f32 %v471_v30, %v470_v26 }
  0xfe   :  { %v449_v36 = vpop.f32.mrf.mxu0  ;;  %v473_v37 = vpop.f32.mrf.mxu1 }
  0xff   :  { %364 = vst [vmem:[%s720_s3 + $0x28] sm:$0xff] %v348_v31  ;;  %372 = vst [vmem:[%s720_s3 + $0x68] sm:$0xff] %v356_v32  ;;  %v305_v38 = vadd.f32 %v448_v33, %v651_v34  ;;  %v337_v39 = vadd.f32 %v472_v35, %v651_v34 }
 0x100   :  { %v450_v40 = vpop.f32.mrf.mxu0  ;;  %v474_v41 = vpop.f32.mrf.mxu1 }
 0x101   :  { %v349_v42 = vmax.f32 %v305_v38, 0.0  ;;  %v357_v43 = vmax.f32 %v337_v39, 0.0  ;;  %v451_v44 = vadd.f32 %v450_v40, %v449_v36  ;;  %v475_v45 = vadd.f32 %v474_v41, %v473_v37 }
 0x103   :  { %365 = vst [vmem:[%s720_s3 + $0x30] sm:$0xff] %v349_v42  ;;  %373 = vst [vmem:[%s720_s3 + $0x70] sm:$0xff] %v357_v43  ;;  %v308_v46 = vadd.f32 %v451_v44, %v651_v34  ;;  %v340_v47 = vadd.f32 %v475_v45, %v651_v34 }
 0x105   :  { %v350_v48 = vmax.f32 %v308_v46, 0.0  ;;  %v358_v49 = vmax.f32 %v340_v47, 0.0 }
 0x107   :  { %366 = vst [vmem:[%s720_s3 + $0x38] sm:$0xff] %v350_v48  ;;  %374 = vst [vmem:[%s720_s3 + $0x78] sm:$0xff] %v358_v49 }

// kernel: dqn_forward.5
= control target key start
LH: loop header
LB: loop body
LE: loop exit
PB: predicated region body
PF: predicated region fallthrough
CT: control target
= control target key end

     0   :  { %s709_s1 = inlined_call_operand.vmem [shape: bf16[512,128], index: 1, kind: input, shape index: {}]   ;;  %s710_s0 = inlined_call_operand.vmem [shape: bf16[24,512], index: 0, kind: input, shape index: {}]   ;;  %s711_s2 = inlined_call_operand.vmem [shape: f32[1,128], index: 2, kind: input, shape index: {}]   ;;  %s712_s3 = inlined_call_operand.vmem [shape: f32[24,128], index: 3, kind: output, shape index: {}]  }
   0x1   :  { %v521_v0 = vld [vmem:[%s709_s1 + $0x78] sm:$0xff]   ;;  %v525_v4 = vld [vmem:[%s709_s1 + $0x70] sm:$0xff]   ;;  %v529_v8 = vld [vmem:[%s709_s1 + $0x68] sm:$0xff]  }
   0x2   :  { %v522_v1 = vld [vmem:[%s709_s1 + $0xf8] sm:$0xff]   ;;  %465 = vmatprep.subr.bf16.mxu0 %v521_v0  ;;  %v526_v5 = vld [vmem:[%s709_s1 + $0xf0] sm:$0xff]   ;;  %v530_v9 = vld [vmem:[%s709_s1 + $0xe8] sm:$0xff]  }
   0x3   :  { %v523_v2 = vld [vmem:[%s709_s1 + $0x38] sm:$0xff]   ;;  %493 = vmatprep.subr.bf16.mxu1 %v522_v1  ;;  %v527_v6 = vld [vmem:[%s709_s1 + $0x30] sm:$0xff]   ;;  %v531_v10 = vld [vmem:[%s709_s1 + $0x28] sm:$0xff]  }
   0x4   :  { %v524_v3 = vld [vmem:[%s709_s1 + $0xb8] sm:$0xff]   ;;  %466 = vmatpush3.bf16.msra.mxu0 %v523_v2  ;;  %v528_v7 = vld [vmem:[%s709_s1 + $0xb0] sm:$0xff]   ;;  %v532_v11 = vld [vmem:[%s709_s1 + $0xa8] sm:$0xff]  }
   0x5   :  { %494 = vmatpush3.bf16.msra.mxu1 %v524_v3  ;;  %467 = vmatprep.subr.bf16.mxu0 %v525_v4  ;;  %v533_v12 = vld [vmem:[%s709_s1 + $0x60] sm:$0xff]   ;;  %v537_v16 = vld [vmem:[%s709_s1 + $0x58] sm:$0xff]   ;;  %v541_v20 = vld [vmem:[%s709_s1 + $0x50] sm:$0xff]  }
   0x6   :  { %495 = vmatprep.subr.bf16.mxu1 %v526_v5  ;;  %v534_v13 = vld [vmem:[%s709_s1 + $0xe0] sm:$0xff]   ;;  %v538_v17 = vld [vmem:[%s709_s1 + $0xd8] sm:$0xff]   ;;  %v542_v21 = vld [vmem:[%s709_s1 + $0xd0] sm:$0xff]  }
   0x7   :  { %v535_v14 = vld [vmem:[%s709_s1 + $0x20] sm:$0xff]   ;;  %v539_v18 = vld [vmem:[%s709_s1 + $0x18] sm:$0xff]   ;;  %v543_v22 = vld [vmem:[%s709_s1 + $0x10] sm:$0xff]  }
   0x8   :  { %468 = vmatpush3.bf16.msra.mxu0 %v527_v6  ;;  %v536_v15 = vld [vmem:[%s709_s1 + $0xa0] sm:$0xff]   ;;  %v540_v19 = vld [vmem:[%s709_s1 + $0x98] sm:$0xff]   ;;  %v544_v23 = vld [vmem:[%s709_s1 + $0x90] sm:$0xff]  }
   0x9   :  { %496 = vmatpush3.bf16.msra.mxu1 %v528_v7  ;;  %469 = vmatprep.subr.bf16.mxu0 %v529_v8  ;;  %v545_v24 = vld [vmem:[%s709_s1 + $0x48] sm:$0xff]   ;;  %v549_v28 = vld [vmem:[%s709_s1 + $0x40] sm:$0xff]  }
   0xa   :  { %497 = vmatprep.subr.bf16.mxu1 %v530_v9  ;;  %v546_v25 = vld [vmem:[%s709_s1 + $0xc8] sm:$0xff]   ;;  %v550_v29 = vld [vmem:[%s709_s1 + $0xc0] sm:$0xff]  }
   0xb   :  { %v547_v26 = vld [vmem:[%s709_s1 + $0x8] sm:$0xff]   ;;  %v551_v30 = vld [vmem:[%s709_s1] sm:$0xff]  }
   0xc   :  { %470 = vmatpush3.bf16.msra.mxu0 %v531_v10  ;;  %v548_v27 = vld [vmem:[%s709_s1 + $0x88] sm:$0xff]   ;;  %v552_v31 = vld [vmem:[%s709_s1 + $0x80] sm:$0xff]  }
   0xd   :  { %498 = vmatpush3.bf16.msra.mxu1 %v532_v11  ;;  %471 = vmatprep.subr.bf16.mxu0 %v533_v12  ;;  %v553_v32 = vld [vmem:[%s710_s0] ss:$16 sps:$4 sm:$0xff]   ;;  %v555_v33 = vld [vmem:[%s710_s0 + $0x4] ss:$16 sps:$4 sm:$0xff]   ;;  %v556_v34 = vld [vmem:[%s710_s0 + $0x8] ss:$16 sps:$4 sm:$0xff]  }
   0xe   :  { %499 = vmatprep.subr.bf16.mxu1 %v534_v13  ;;  %v558_v35 = vld [vmem:[%s710_s0 + $0xc] ss:$16 sps:$4 sm:$0xff]   ;;  %v19_v36 = vld [vmem:[%s710_s0 + $0x20] sm:$0xff]  ;;  %350 = vmatprep.mubr.bf16.mxu0 %v555_v33 }
   0xf   :  { %v430_v37 = vcombine.high %v19_v36, %v19_v36  ;;  %v20_v38 = vld [vmem:[%s710_s0 + $0x28] sm:$0xff]  ;;  %398 = vmatprep.mubr.bf16.mxu1 %v558_v35  ;;  %v429_v40 = vcombine.low %v19_v36, %v19_v36  ;;  %v424_v44 = vld [vmem:[%s711_s2] ss:$0 sm:$0xff] }
  0x10   :  { %472 = vmatpush3.bf16.msra.mxu0 %v535_v14  ;;  %v432_v39 = vcombine.high %v20_v38, %v20_v38  ;;  %v431_v41 = vcombine.low %v20_v38, %v20_v38 }
  0x11   :  { %500 = vmatpush3.bf16.msra.mxu1 %v536_v15  ;;  %473 = vmatprep.subr.bf16.mxu0 %v537_v16 }
  0x12   :  { %501 = vmatprep.subr.bf16.mxu1 %v538_v17 }
  0x14   :  { %474 = vmatpush3.bf16.msra.mxu0 %v539_v18 }
  0x15   :  { %502 = vmatpush3.bf16.msra.mxu1 %v540_v19  ;;  %475 = vmatprep.subr.bf16.mxu0 %v541_v20 }
  0x16   :  { %503 = vmatprep.subr.bf16.mxu1 %v542_v21 }
  0x18   :  { %476 = vmatpush3.bf16.msra.mxu0 %v543_v22 }
  0x19   :  { %504 = vmatpush3.bf16.msra.mxu1 %v544_v23  ;;  %477 = vmatprep.subr.bf16.mxu0 %v545_v24 }
  0x1a   :  { %505 = vmatprep.subr.bf16.mxu1 %v546_v25 }
  0x1c   :  { %478 = vmatpush3.bf16.msra.mxu0 %v547_v26 }
  0x1d   :  { %506 = vmatpush3.bf16.msra.mxu1 %v548_v27  ;;  %479 = vmatprep.subr.bf16.mxu0 %v549_v28 }
  0x1e   :  { %507 = vmatprep.subr.bf16.mxu1 %v550_v29 }
  0x20   :  { %480 = vmatpush3.bf16.msra.mxu0 %v551_v30 }
  0x21   :  { %508 = vmatpush3.bf16.msra.mxu1 %v552_v31 }
  0x23   :  { %351 = vmatmul.mubr.bf16.vlgmr.msra.gmra.mxu0 %v553_v32 }
  0x24   :  { %399 = vmatmul.mubr.bf16.vlgmr.msra.gmra.mxu1 %v556_v34  ;;  %358 = vmatprep.mubr.bf16.mxu0 %v430_v37 }
  0x25   :  { %406 = vmatprep.mubr.bf16.mxu1 %v432_v39 }
  0x2b   :  { %359 = vmatmul.mubr.bf16.gmra.mxu0 %v429_v40 }
  0x2c   :  { %407 = vmatmul.mubr.bf16.gmra.mxu1 %v431_v41 }
  0xe3   :  { %v481_v42 = vpop.f32.mrf.mxu0 }
  0xe4   :  { %v509_v43 = vpop.f32.mrf.mxu1 }
  0xe5   :  { %v482_v45 = vpop.f32.mrf.mxu0 }
  0xe6   :  { %v483_v46 = vadd.f32 %v482_v45, %v481_v42  ;;  %v510_v47 = vpop.f32.mrf.mxu1 }
  0xe7   :  { %v484_v48 = vpop.f32.mrf.mxu0  ;;  %v511_v50 = vadd.f32 %v510_v47, %v509_v43 }
  0xe8   :  { %v353_v49 = vadd.f32 %v483_v46, %v424_v44  ;;  %v512_v51 = vpop.f32.mrf.mxu1 }
  0xe9   :  { %v485_v52 = vpop.f32.mrf.mxu0 }
  0xea   :  { %v401_v53 = vadd.f32 %v511_v50, %v353_v49  ;;  %v486_v54 = vadd.f32 %v485_v52, %v484_v48  ;;  %v513_v55 = vpop.f32.mrf.mxu1 }
  0xeb   :  { %v487_v56 = vpop.f32.mrf.mxu0  ;;  %v514_v59 = vadd.f32 %v513_v55, %v512_v51 }
  0xec   :  { %v414_v57 = vmax.f32 %v401_v53, 0.0  ;;  %v356_v58 = vadd.f32 %v486_v54, %v424_v44  ;;  %v515_v60 = vpop.f32.mrf.mxu1 }
  0xed   :  { %v488_v61 = vpop.f32.mrf.mxu0 }
  0xee   :  { %417 = vst [vmem:[%s712_s3] sm:$0xff] %v414_v57  ;;  %v404_v62 = vadd.f32 %v514_v59, %v356_v58  ;;  %v489_v63 = vadd.f32 %v488_v61, %v487_v56  ;;  %v516_v0 = vpop.f32.mrf.mxu1 }
  0xef   :  { %v490_v1 = vpop.f32.mrf.mxu0  ;;  %v517_v4 = vadd.f32 %v516_v0, %v515_v60 }
  0xf0   :  { %v415_v2 = vmax.f32 %v404_v62, 0.0  ;;  %v361_v3 = vadd.f32 %v489_v63, %v424_v44  ;;  %v518_v5 = vpop.f32.mrf.mxu1 }
  0xf1   :  { %v491_v6 = vpop.f32.mrf.mxu0 }
  0xf2   :  { %418 = vst [vmem:[%s712_s3 + $0x8] sm:$0xff] %v415_v2  ;;  %v409_v7 = vadd.f32 %v517_v4, %v361_v3  ;;  %v519_v8 = vpop.f32.mrf.mxu1 }
  0xf4   :  { %v416_v9 = vmax.f32 %v409_v7, 0.0 }
  0xf6   :  { %419 = vst [vmem:[%s712_s3 + $0x10] sm:$0xff] %v416_v9 }

// kernel: dqn_forward.6
= control target key start
LH: loop header
LB: loop body
LE: loop exit
PB: predicated region body
PF: predicated region fallthrough
CT: control target
= control target key end

     0   :  { %v655_v35 = vmov 0.0   ;;  %vm656_vm0 = vmmov 0   ;;  %s812_s1 = inlined_call_operand.vmem [shape: bf16[640,128], index: 1, kind: input, shape index: {}]   ;;  %s813_s0 = inlined_call_operand.vmem [shape: bf16[8,640], index: 0, kind: input, shape index: {}]   ;;  %s814_s2 = inlined_call_operand.vmem [shape: f32[1,128], index: 2, kind: input, shape index: {}]   ;;  %s815_s3 = inlined_call_operand.vmem [shape: f32[8,128], index: 3, kind: output, shape index: {}]  }
   0x1   :  { %v610_v0 = vld [vmem:[%s812_s1 + $0x78] sm:$0xff]   ;;  %v614_v4 = vld [vmem:[%s812_s1 + $0x70] sm:$0xff]   ;;  %v618_v8 = vld [vmem:[%s812_s1 + $0x68] sm:$0xff]  }
   0x2   :  { %v611_v1 = vld [vmem:[%s812_s1 + $0x38] sm:$0xff]   ;;  %535 = vmatprep.subr.bf16.mxu0 %v610_v0  ;;  %v615_v5 = vld [vmem:[%s812_s1 + $0x30] sm:$0xff]   ;;  %v619_v9 = vld [vmem:[%s812_s1 + $0x28] sm:$0xff]  }
   0x3   :  { %v612_v2 = vld [vmem:[%s812_s1 + $0xf8] sm:$0xff]   ;;  %536 = vmatpush3.bf16.msra.mxu0 %v611_v1  ;;  %v616_v6 = vld [vmem:[%s812_s1 + $0xf0] sm:$0xff]   ;;  %v620_v10 = vld [vmem:[%s812_s1 + $0xe8] sm:$0xff]  }
   0x4   :  { %v613_v3 = vld [vmem:[%s812_s1 + $0xb8] sm:$0xff]   ;;  %557 = vmatprep.subr.bf16.mxu1 %v612_v2  ;;  %537 = vmatprep.subr.bf16.mxu0 %v614_v4  ;;  %v617_v7 = vld [vmem:[%s812_s1 + $0xb0] sm:$0xff]   ;;  %v621_v11 = vld [vmem:[%s812_s1 + $0xa8] sm:$0xff]  }
   0x5   :  { %558 = vmatpush3.bf16.msra.mxu1 %v613_v3  ;;  %v622_v12 = vld [vmem:[%s812_s1 + $0x60] sm:$0xff]   ;;  %v626_v16 = vld [vmem:[%s812_s1 + $0x58] sm:$0xff]   ;;  %v630_v20 = vld [vmem:[%s812_s1 + $0x50] sm:$0xff]  }
   0x6   :  { %559 = vmatprep.subr.bf16.mxu1 %v616_v6  ;;  %v623_v13 = vld [vmem:[%s812_s1 + $0x20] sm:$0xff]   ;;  %v627_v17 = vld [vmem:[%s812_s1 + $0x18] sm:$0xff]   ;;  %v631_v21 = vld [vmem:[%s812_s1 + $0x10] sm:$0xff]  }
   0x7   :  { %538 = vmatpush3.bf16.msra.mxu0 %v615_v5  ;;  %v624_v14 = vld [vmem:[%s812_s1 + $0xe0] sm:$0xff]   ;;  %v628_v18 = vld [vmem:[%s812_s1 + $0xd8] sm:$0xff]   ;;  %v632_v22 = vld [vmem:[%s812_s1 + $0xd0] sm:$0xff]  }
   0x8   :  { %539 = vmatprep.subr.bf16.mxu0 %v618_v8  ;;  %v625_v15 = vld [vmem:[%s812_s1 + $0xa0] sm:$0xff]   ;;  %v629_v19 = vld [vmem:[%s812_s1 + $0x98] sm:$0xff]   ;;  %v633_v23 = vld [vmem:[%s812_s1 + $0x90] sm:$0xff]  }
   0x9   :  { %560 = vmatpush3.bf16.msra.mxu1 %v617_v7  ;;  %v634_v24 = vld [vmem:[%s812_s1 + $0x48] sm:$0xff]   ;;  %v638_v28 = vld [vmem:[%s812_s1 + $0x40] sm:$0xff]   ;;  %v647_v39 = vld [vmem:[%s812_s1 + $0x138] sm:$0xff]  }
   0xa   :  { %561 = vmatprep.subr.bf16.mxu1 %v620_v10  ;;  %v635_v25 = vld [vmem:[%s812_s1 + $0x8] sm:$0xff]   ;;  %v639_v29 = vld [vmem:[%s812_s1] sm:$0xff]   ;;  %v648_v40 = vld [vmem:[%s812_s1 + $0x130] sm:$0xff]  }
   0xb   :  { %540 = vmatpush3.bf16.msra.mxu0 %v619_v9  ;;  %v636_v26 = vld [vmem:[%s812_s1 + $0xc8] sm:$0xff]   ;;  %v640_v30 = vld [vmem:[%s812_s1 + $0xc0] sm:$0xff]   ;;  %v651_v43 = vld [vmem:[%s812_s1 + $0x118] sm:$0xff]  }
   0xc   :  { %541 = vmatprep.subr.bf16.mxu0 %v622_v12  ;;  %v637_v27 = vld [vmem:[%s812_s1 + $0x88] sm:$0xff]   ;;  %v15_v31 = vld [vmem:[%s813_s0] sm:$0xff]  ;;  %v652_v44 = vld [vmem:[%s812_s1 + $0x110] sm:$0xff]  }
   0xd   :  { %562 = vmatpush3.bf16.msra.mxu1 %v621_v11  ;;  %v490_v32 = vcombine.low %v15_v31, %v15_v31  ;;  %v491_v33 = vcombine.high %v15_v31, %v15_v31  ;;  %v644_v34 = vld [vmem:[%s812_s1 + $0x80] sm:$0xff]   ;;  %v16_v36 = vld [vmem:[%s813_s0 + $0x8] sm:$0xff]  ;;  %v643_v47 = vld [vmem:[%s813_s0 + $0x10] ss:$0 sps:$4 sm:$0xff]  }
   0xe   :  { %563 = vmatprep.subr.bf16.mxu1 %v624_v14  ;;  %v492_v37 = vcombine.low %v16_v36, %v16_v36  ;;  %v493_v38 = vcombine.high %v16_v36, %v16_v36  ;;  %v649_v41 = vld [vmem:[%s812_s1 + $0x128] sm:$0xff]   ;;  %v650_v42 = vld [vmem:[%s812_s1 + $0x120] sm:$0xff]  }
   0xf   :  { %542 = vmatpush3.bf16.msra.mxu0 %v623_v13  ;;  %395 = vmatprep.mubr.bf16.mxu0 %v491_v33  ;;  %v653_v45 = vld [vmem:[%s812_s1 + $0x108] sm:$0xff]   ;;  %v654_v46 = vld [vmem:[%s812_s1 + $0x100] sm:$0xff]  }
  0x10   :  { %543 = vmatprep.subr.bf16.mxu0 %v626_v16  ;;  %435 = vmatprep.mubr.bf16.mxu1 %v493_v38  ;;  %v489_v57 = vld [vmem:[%s814_s2] ss:$0 sm:$0xff] }
  0x11   :  { %564 = vmatpush3.bf16.msra.mxu1 %v625_v15 }
  0x12   :  { %565 = vmatprep.subr.bf16.mxu1 %v628_v18 }
  0x13   :  { %544 = vmatpush3.bf16.msra.mxu0 %v627_v17 }
  0x14   :  { %545 = vmatprep.subr.bf16.mxu0 %v630_v20 }
  0x15   :  { %566 = vmatpush3.bf16.msra.mxu1 %v629_v19 }
  0x16   :  { %567 = vmatprep.subr.bf16.mxu1 %v632_v22 }
  0x17   :  { %546 = vmatpush3.bf16.msra.mxu0 %v631_v21 }
  0x18   :  { %547 = vmatprep.subr.bf16.mxu0 %v634_v24 }
  0x19   :  { %568 = vmatpush3.bf16.msra.mxu1 %v633_v23 }
  0x1a   :  { %569 = vmatprep.subr.bf16.mxu1 %v636_v26 }
  0x1b   :  { %548 = vmatpush3.bf16.msra.mxu0 %v635_v25 }
  0x1c   :  { %549 = vmatprep.subr.bf16.mxu0 %v638_v28 }
  0x1d   :  { %570 = vmatpush3.bf16.msra.mxu1 %v637_v27 }
  0x1e   :  { %571 = vmatprep.subr.bf16.mxu1 %v640_v30 }
  0x1f   :  { %550 = vmatpush3.bf16.msra.mxu0 %v639_v29 }
  0x20   :  { %588 = vmatprep.subr.bf16.mxu0 %v655_v35 }
  0x21   :  { %572 = vmatpush3.bf16.msra.mxu1 %v644_v34 }
  0x22   :  { %396 = vmatmul.mubr.bf16.vlgmr.msra.gmra.mxu0 %v490_v32 }
  0x23   :  { %589 = vmatpush3.bf16.msra.mxu0 %v647_v39  ;;  %604 = vmatprep.mubr.msk.bf16.mxu0 %vm656_vm0, %v655_v35 }
  0x24   :  { %436 = vmatmul.mubr.bf16.vlgmr.msra.gmra.mxu1 %v492_v37  ;;  %590 = vmatprep.subr.bf16.mxu0 %v655_v35 }
  0x27   :  { %591 = vmatpush3.bf16.msra.mxu0 %v648_v40 }
  0x28   :  { %592 = vmatprep.subr.bf16.mxu0 %v655_v35 }
  0x2b   :  { %593 = vmatpush3.bf16.msra.mxu0 %v649_v41 }
  0x2c   :  { %594 = vmatprep.subr.bf16.mxu0 %v655_v35 }
  0x2f   :  { %595 = vmatpush3.bf16.msra.mxu0 %v650_v42 }
  0x30   :  { %596 = vmatprep.subr.bf16.mxu0 %v655_v35 }
  0x33   :  { %597 = vmatpush3.bf16.msra.mxu0 %v651_v43 }
  0x34   :  { %598 = vmatprep.subr.bf16.mxu0 %v655_v35 }
  0x37   :  { %599 = vmatpush3.bf16.msra.mxu0 %v652_v44 }
  0x38   :  { %600 = vmatprep.subr.bf16.mxu0 %v655_v35 }
  0x3b   :  { %601 = vmatpush3.bf16.msra.mxu0 %v653_v45 }
  0x3c   :  { %602 = vmatprep.subr.bf16.mxu0 %v655_v35 }
  0x3f   :  { %603 = vmatpush3.bf16.msra.mxu0 %v654_v46 }
  0x42   :  { %605 = vmatmul.mubr.bf16.vlgmr.msra.gmra.mxu0 %v643_v47 }
  0xe2   :  { %v551_v48 = vpop.f32.mrf.mxu0 }
  0xe4   :  { %v552_v49 = vpop.f32.mrf.mxu0  ;;  %v573_v50 = vpop.f32.mrf.mxu1 }
  0xe5   :  { %v553_v56 = vadd.f32 %v552_v49, %v551_v48 }
  0xe6   :  { %v554_v51 = vpop.f32.mrf.mxu0  ;;  %v574_v52 = vpop.f32.mrf.mxu1 }
  0xe7   :  { %v398_v58 = vadd.f32 %v553_v56, %v489_v57  ;;  %v575_v59 = vadd.f32 %v574_v52, %v573_v50 }
  0xe8   :  { %v555_v53 = vpop.f32.mrf.mxu0  ;;  %v576_v54 = vpop.f32.mrf.mxu1 }
  0xe9   :  { %v438_v60 = vadd.f32 %v575_v59, %v398_v58 }
  0xea   :  { %v577_v55 = vpop.f32.mrf.mxu1 }
 0x102   :  { %v477_v61 = vpop.f32.mrf.mxu0 }
 0x103   :  { %v478_v62 = vadd.f32 %v477_v61, %v438_v60 }
 0x104   :  { %v606_v63 = vpop.f32.mrf.mxu0 }
 0x105   :  { %v483_v0 = vmax.f32 %v478_v62, 0.0 }
 0x106   :  { %v480_v1 = vpop.f32.mrf.mxu0 }
 0x107   :  { %484 = vst [vmem:[%s815_s3] sm:$0xff] %v483_v0 }
 0x108   :  { %v607_v2 = vpop.f32.mrf.mxu0 }

// kernel: dqn_forward.7
= control target key start
LH: loop header
LB: loop body
LE: loop exit
PB: predicated region body
PF: predicated region fallthrough
CT: control target
= control target key end

     0   :  { %v345_v0 = vmov 0.0   ;;  %vm346_vm0 = vmmov 0   ;;  %s437_s1 = inlined_call_operand.vmem [shape: bf16[128,128], index: 1, kind: input, shape index: {}]   ;;  %s438_s3 = inlined_call_operand.vmem [shape: bf16[128,128], index: 3, kind: input, shape index: {}]   ;;  %s439_s0 = inlined_call_operand.vmem [shape: bf16[8,128], index: 0, kind: input, shape index: {}]   ;;  %s440_s2 = inlined_call_operand.vmem [shape: f32[1,128], index: 2, kind: input, shape index: {}]   ;;  %s441_s4 = inlined_call_operand.vmem [shape: f32[1,128], index: 4, kind: input, shape index: {}]   ;;  %s442_s5 = inlined_call_operand.vmem [shape: f32[8,128], index: 5, kind: output, shape index: {}]  }
   0x1   :  { %287 = vmatprep.subr.bf16.mxu0 %v345_v0  ;;  %v329_v1 = vld [vmem:[%s437_s1 + $0x38] sm:$0xff]   ;;  %303 = vmatprep.mubr.msk.bf16.mxu0 %vm346_vm0, %v345_v0  ;;  %v330_v2 = vld [vmem:[%s437_s1 + $0x30] sm:$0xff]   ;;  %v331_v3 = vld [vmem:[%s437_s1 + $0x28] sm:$0xff]  }
   0x2   :  { %307 = vmatprep.subr.bf16.mxu1 %v345_v0  ;;  %323 = vmatprep.mubr.msk.bf16.mxu1 %vm346_vm0, %v345_v0  ;;  %v337_v4 = vld [vmem:[%s438_s3 + $0x38] sm:$0xff]   ;;  %v332_v5 = vld [vmem:[%s437_s1 + $0x20] sm:$0xff]   ;;  %v338_v6 = vld [vmem:[%s438_s3 + $0x30] sm:$0xff]  }
   0x3   :  { %288 = vmatpush3.bf16.msra.mxu0 %v329_v1  ;;  %308 = vmatpush3.bf16.msra.mxu1 %v337_v4  ;;  %v333_v7 = vld [vmem:[%s437_s1 + $0x18] sm:$0xff]   ;;  %v339_v8 = vld [vmem:[%s438_s3 + $0x28] sm:$0xff]   ;;  %v334_v9 = vld [vmem:[%s437_s1 + $0x10] sm:$0xff]  }
   0x4   :  { %289 = vmatprep.subr.bf16.mxu0 %v345_v0  ;;  %309 = vmatprep.subr.bf16.mxu1 %v345_v0  ;;  %v340_v10 = vld [vmem:[%s438_s3 + $0x20] sm:$0xff]   ;;  %v335_v11 = vld [vmem:[%s437_s1 + $0x8] sm:$0xff]   ;;  %v341_v12 = vld [vmem:[%s438_s3 + $0x18] sm:$0xff]  }
   0x5   :  { %v336_v13 = vld [vmem:[%s437_s1] sm:$0xff]   ;;  %v342_v14 = vld [vmem:[%s438_s3 + $0x10] sm:$0xff]   ;;  %v343_v16 = vld [vmem:[%s438_s3 + $0x8] sm:$0xff]  }
   0x6   :  { %v21_v15 = vld [vmem:[%s439_s0] sm:$0xf] }
   0x7   :  { %290 = vmatpush3.bf16.msra.mxu0 %v330_v2  ;;  %310 = vmatpush3.bf16.msra.mxu1 %v338_v6  ;;  %v344_v17 = vld [vmem:[%s438_s3] sm:$0xff]  }
   0x8   :  { %291 = vmatprep.subr.bf16.mxu0 %v345_v0  ;;  %311 = vmatprep.subr.bf16.mxu1 %v345_v0  ;;  %v251_v18 = vld [vmem:[%s440_s2] ss:$0 sm:$0xff] }
   0x9   :  { %v260_v26 = vld [vmem:[%s441_s4] ss:$0 sm:$0xff] }
   0xb   :  { %292 = vmatpush3.bf16.msra.mxu0 %v331_v3  ;;  %312 = vmatpush3.bf16.msra.mxu1 %v339_v8 }
   0xc   :  { %293 = vmatprep.subr.bf16.mxu0 %v345_v0  ;;  %313 = vmatprep.subr.bf16.mxu1 %v345_v0 }
   0xf   :  { %294 = vmatpush3.bf16.msra.mxu0 %v332_v5  ;;  %314 = vmatpush3.bf16.msra.mxu1 %v340_v10 }
  0x10   :  { %295 = vmatprep.subr.bf16.mxu0 %v345_v0  ;;  %315 = vmatprep.subr.bf16.mxu1 %v345_v0 }
  0x13   :  { %296 = vmatpush3.bf16.msra.mxu0 %v333_v7  ;;  %316 = vmatpush3.bf16.msra.mxu1 %v341_v12 }
  0x14   :  { %297 = vmatprep.subr.bf16.mxu0 %v345_v0  ;;  %317 = vmatprep.subr.bf16.mxu1 %v345_v0 }
  0x17   :  { %298 = vmatpush3.bf16.msra.mxu0 %v334_v9  ;;  %318 = vmatpush3.bf16.msra.mxu1 %v342_v14 }
  0x18   :  { %299 = vmatprep.subr.bf16.mxu0 %v345_v0  ;;  %319 = vmatprep.subr.bf16.mxu1 %v345_v0 }
  0x1b   :  { %300 = vmatpush3.bf16.msra.mxu0 %v335_v11  ;;  %320 = vmatpush3.bf16.msra.mxu1 %v343_v16 }
  0x1c   :  { %301 = vmatprep.subr.bf16.mxu0 %v345_v0  ;;  %321 = vmatprep.subr.bf16.mxu1 %v345_v0 }
  0x1f   :  { %302 = vmatpush3.bf16.msra.mxu0 %v336_v13  ;;  %322 = vmatpush3.bf16.msra.mxu1 %v344_v17 }
  0x22   :  { %304 = vmatmul.mubr.bf16.vlgmr.msra.gmra.mxu0 %v21_v15 }
  0xe2   :  { %v127_v19 = vpop.f32.mrf.mxu0 }
  0xe3   :  { %v128_v20 = vadd.f32 %v251_v18, %v127_v19 }
  0xe4   :  { %v305_v21 = vpop.f32.mrf.mxu0 }
  0xe5   :  { %v133_v22 = vmax.f32 %v128_v20, 0.0 }
  0xe6   :  { %v130_v23 = vpop.f32.mrf.mxu0 }
  0xe7   :  { %v134_v24 = vpack.c.bf16 %v133_v22, %v133_v22 }
  0xe8   :  { %v306_v25 = vpop.f32.mrf.mxu0 }
  0xe9   :  { %324 = vmatmul.mubr.bf16.vlgmr.msra.gmra.mxu1 %v134_v24 }
 0x1a9   :  { %v240_v27 = vpop.f32.mrf.mxu1 }
 0x1aa   :  { %v241_v28 = vadd.f32 %v260_v26, %v240_v27 }
 0x1ab   :  { %v325_v29 = vpop.f32.mrf.mxu1 }
 0x1ac   :  { %246 = vst [vmem:[%s442_s5] sm:$0xff] %v241_v28 }
 0x1ad   :  { %v243_v30 = vpop.f32.mrf.mxu1 }
 0x1af   :  { %v326_v31 = vpop.f32.mrf.mxu1 }

</bundles_post_ra>
